<compile_context>
chip_gen: v7x
topology: tpu7x:2x2x1
jax: 0.10.0
libtpu: 0.0.40
codegen_flags: <defaults>
</compile_context>

<pallas_src>
import jax
import jax.numpy as jnp
from jax.experimental import pallas as pl
from jax.experimental.pallas import tpu as pltpu


def _round_up(n, m):
    return ((n + m - 1) // m) * m


def dqn_kernel(x_ref, w1_ref, w23_ref, b_ref, o_ref):
    """One batch tile of the 3-layer MLP. All weights are VMEM-resident.

    x_ref   : (TB, n_obs)   bf16
    w1_ref  : (n_obs, H)    bf16
    w23_ref : (2, H, H)     bf16  -> [0] = W2, [1] = W3 zero-padded to H cols
    b_ref   : (3, H)        f32   -> rows = b1, b2, b3 (zero-padded)
    o_ref   : (TB, n_act)   f32   -> Q-values (masked store of n_act lanes)
    """
    n_act = o_ref.shape[1]
    b = b_ref[...]                                    # (3, H) f32, tiny tile

    # Layer 1: Linear(n_obs, H) + ReLU  (bf16 MXU matmul, f32 accumulation)
    # NOTE: with K=n_obs=8 this could be done as 8 VPU multiply-adds instead
    # of an MXU pass; only worth it if a bundle dump shows the MXU slot bound.
    h1 = jnp.dot(x_ref[...], w1_ref[...], preferred_element_type=jnp.float32)
    h1 = jnp.maximum(h1 + b[0:1, :], 0.0).astype(jnp.bfloat16)

    # Layer 2: Linear(H, H) + ReLU      (first-axis index = free view)
    h2 = jnp.dot(h1, w23_ref[0], preferred_element_type=jnp.float32)
    h2 = jnp.maximum(h2 + b[1:2, :], 0.0).astype(jnp.bfloat16)

    # Layer 3: Linear(H, n_actions); only the first n_act lanes are meaningful.
    q = jnp.dot(h2, w23_ref[1], preferred_element_type=jnp.float32)
    o_ref[...] = (q + b[2:3, :])[:, :n_act]


def pack_params(params):
    """Pack raw (w1,b1,w2,b2,w3,b3) -> (w1_bf16, w23_bf16, b_all_f32), n_actions.

    Do this ONCE per parameter update (or once for a frozen target network),
    not per forward call. Weights are (in, out); biases are (out,).
    """
    w1, b1, w2, b2, w3, b3 = params
    H = w1.shape[1]
    n_actions = w3.shape[1]

    w3p = jnp.zeros((H, H), jnp.bfloat16).at[:, :n_actions].set(
        w3.astype(jnp.bfloat16))
    w23 = jnp.stack([w2.astype(jnp.bfloat16), w3p])          # (2, H, H) bf16
    b3p = jnp.zeros((H,), jnp.float32).at[:n_actions].set(b3.astype(jnp.float32))
    b_all = jnp.stack([b1.reshape(H).astype(jnp.float32),
                       b2.reshape(H).astype(jnp.float32),
                       b3p])                                   # (3, H) f32
    return (w1.astype(jnp.bfloat16), w23, b_all), n_actions


def dqn_forward(x, w1, w23, b_all, *, n_actions, block_b=1024, min_grid_steps=1):
    """Q(x) for a batch of observations, using pre-packed parameters.

    min_grid_steps: set to 2 on v7x for large batches so the ("parallel",)
    batch grid shards across both TensorCores; leave at 1 on v5e/v6e.
    """
    B, n_obs = x.shape
    H = w1.shape[1]                       # 128

    # ---- batch tiling (TB always a multiple of 8 sublanes) -------------------
    Bp8 = _round_up(B, 8)
    TB = min(_round_up(block_b, 8), Bp8)
    if min_grid_steps > 1:
        TB = min(TB, _round_up(pl.cdiv(Bp8, min_grid_steps), 8))
    Bp = _round_up(B, TB)

    x = x.astype(jnp.bfloat16)
    if Bp != B:
        x = jnp.pad(x, ((0, Bp - B), (0, 0)))
    grid = (Bp // TB,)

    # ---- advisory cost model for the XLA scheduler --------------------------
    flops = 2 * Bp * (n_obs * H + H * H + H * H)
    bytes_accessed = (Bp * n_obs * 2            # x (bf16)
                      + n_obs * H * 2           # w1 (bf16)
                      + 2 * H * H * 2           # w2|w3 (bf16)
                      + 3 * H * 4               # biases (f32)
                      + Bp * n_actions * 4)     # out (f32)
    cost = pl.CostEstimate(flops=flops, transcendentals=0,
                           bytes_accessed=bytes_accessed)

    out = pl.pallas_call(
        dqn_kernel,
        out_shape=jax.ShapeDtypeStruct((Bp, n_actions), jnp.float32),
        grid=grid,
        in_specs=[
            pl.BlockSpec((TB, n_obs), lambda i: (i, 0)),      # x: streamed per tile
            pl.BlockSpec((n_obs, H), lambda i: (0, 0)),       # w1: VMEM-resident
            pl.BlockSpec((2, H, H), lambda i: (0, 0, 0)),     # [W2, W3_pad]: resident
            pl.BlockSpec((3, H), lambda i: (0, 0)),           # [b1; b2; b3_pad]: resident
        ],
        out_specs=pl.BlockSpec((TB, n_actions), lambda i: (i, 0)),
        compiler_params=pltpu.CompilerParams(
            dimension_semantics=("parallel",)),               # shard batch over TCs (v7x)
        cost_estimate=cost,
    )(x, w1, w23, b_all)

    return out[:B]


def init_params(key, n_observations, n_actions, hidden=128):
    # Mimics PyTorch Linear's U(-1/sqrt(fan_in), 1/sqrt(fan_in)) init.
    def linear(key, fan_in, fan_out):
        kw, kb = jax.random.split(key)
        bound = 1.0 / (fan_in ** 0.5)
        w = jax.random.uniform(kw, (fan_in, fan_out), jnp.float32, -bound, bound)
        b = jax.random.uniform(kb, (fan_out,), jnp.float32, -bound, bound)
        return w, b

    k1, k2, k3 = jax.random.split(key, 3)
    w1, b1 = linear(k1, n_observations, hidden)
    w2, b2 = linear(k2, hidden, hidden)
    w3, b3 = linear(k3, hidden, n_actions)
    return w1, b1, w2, b2, w3, b3


if __name__ == "__main__":
    key = jax.random.PRNGKey(0)
    kx, kp = jax.random.split(key)

    batch = 37           # non-multiple of 8: exercises batch padding
    n_observations = 8   # CartPole-like state
    n_actions = 4

    x = jax.random.normal(kx, (batch, n_observations), jnp.float32)
    params = init_params(kp, n_observations, n_actions)

    # Pack once (per parameter update), forward many times.
    packed, n_act = pack_params(params)

    fwd = jax.jit(dqn_forward,
                  static_argnames=("n_actions", "block_b", "min_grid_steps"))
    # block_b=16 forces a 3-step grid at this size to exercise streaming + padding.
    out = fwd(x, *packed, n_actions=n_act, block_b=16, min_grid_steps=1)
    jax.block_until_ready(out)

    # Pure-JAX f32 reference of the same forward pass (bf16 weights -> looser tol).
    w1, b1, w2, b2, w3, b3 = params
    ref = jnp.maximum(x @ w1 + b1, 0.0)
    ref = jnp.maximum(ref @ w2 + b2, 0.0)
    ref = ref @ w3 + b3
    assert out.shape == (batch, n_actions)
    assert jnp.allclose(out, ref, atol=2e-2, rtol=2e-2), \
        float(jnp.max(jnp.abs(out - ref)))

    print("KERNEL_OK")
</pallas_src>

<mosaic_0001>
module attributes {stable_mosaic.version = 11 : i64} {
  func.func @dqn_kernel(%arg0: i32, %arg1: memref<16x8xbf16, #tpu.memory_space<vmem>>, %arg2: memref<8x128xbf16, #tpu.memory_space<vmem>>, %arg3: memref<2x128x128xbf16, #tpu.memory_space<vmem>>, %arg4: memref<3x128xf32, #tpu.memory_space<vmem>>, %arg5: memref<16x4xf32, #tpu.memory_space<vmem>>) attributes {dimension_semantics = [#tpu.dimension_semantics<parallel>], iteration_bounds = array<i64: 3>, scalar_prefetch = 0 : i64, scratch_operands = 0 : i64, tpu.core_type = #tpu.core_type<tc>, window_params = [{transform_indices = @transform_0, window_bounds = array<i64: 16, 8>}, {pipeline_mode = #tpu.pipeline_mode<synchronous>, transform_indices = @transform_1, window_bounds = array<i64: 8, 128>}, {pipeline_mode = #tpu.pipeline_mode<synchronous>, transform_indices = @transform_2, window_bounds = array<i64: 2, 128, 128>}, {pipeline_mode = #tpu.pipeline_mode<synchronous>, transform_indices = @transform_3, window_bounds = array<i64: 3, 128>}, {transform_indices = @transform_4, window_bounds = array<i64: 16, 4>}]} {
    %c0 = arith.constant 0 : index
    %c0_0 = arith.constant 0 : index
    %0 = vector.load %arg4[%c0, %c0_0] : memref<3x128xf32, #tpu.memory_space<vmem>>, vector<3x128xf32>
    %c0_1 = arith.constant 0 : index
    %c0_2 = arith.constant 0 : index
    %1 = vector.load %arg1[%c0_1, %c0_2] : memref<16x8xbf16, #tpu.memory_space<vmem>>, vector<16x8xbf16>
    %c0_3 = arith.constant 0 : index
    %c0_4 = arith.constant 0 : index
    %2 = vector.load %arg2[%c0_3, %c0_4] : memref<8x128xbf16, #tpu.memory_space<vmem>>, vector<8x128xbf16>
    %cst = arith.constant dense<0.000000e+00> : vector<16x128xf32>
    %3 = tpu.matmul %1, %2, %cst {dimension_numbers = #tpu.dot_dimension_numbers<[1], [0], [0], [1], [0, 0, 1, 1], [], []>} : vector<16x8xbf16>, vector<8x128xbf16>, vector<16x128xf32> -> vector<16x128xf32>
    %4 = vector.extract_strided_slice %0 {offsets = [0, 0], sizes = [1, 128], strides = [1, 1]} : vector<3x128xf32> to vector<1x128xf32>
    %5 = vector.broadcast %4 : vector<1x128xf32> to vector<16x128xf32>
    %6 = arith.addf %3, %5 : vector<16x128xf32>
    %cst_5 = arith.constant 0.000000e+00 : f32
    %7 = vector.broadcast %cst_5 : f32 to vector<16x128xf32>
    %8 = arith.maximumf %6, %7 : vector<16x128xf32>
    %9 = arith.truncf %8 : vector<16x128xf32> to vector<16x128xbf16>
    %c0_6 = arith.constant 0 : index
    %c0_7 = arith.constant 0 : index
    %c0_8 = arith.constant 0 : index
    %10 = vector.load %arg3[%c0_6, %c0_7, %c0_8] : memref<2x128x128xbf16, #tpu.memory_space<vmem>>, vector<1x128x128xbf16>
    %11 = vector.shape_cast %10 : vector<1x128x128xbf16> to vector<128x128xbf16>
    %cst_9 = arith.constant dense<0.000000e+00> : vector<16x128xf32>
    %12 = tpu.matmul %9, %11, %cst_9 {dimension_numbers = #tpu.dot_dimension_numbers<[1], [0], [0], [1], [0, 0, 1, 1], [], []>} : vector<16x128xbf16>, vector<128x128xbf16>, vector<16x128xf32> -> vector<16x128xf32>
    %13 = vector.extract_strided_slice %0 {offsets = [1, 0], sizes = [1, 128], strides = [1, 1]} : vector<3x128xf32> to vector<1x128xf32>
    %14 = vector.broadcast %13 : vector<1x128xf32> to vector<16x128xf32>
    %15 = arith.addf %12, %14 : vector<16x128xf32>
    %cst_10 = arith.constant 0.000000e+00 : f32
    %16 = vector.broadcast %cst_10 : f32 to vector<16x128xf32>
    %17 = arith.maximumf %15, %16 : vector<16x128xf32>
    %18 = arith.truncf %17 : vector<16x128xf32> to vector<16x128xbf16>
    %c1 = arith.constant 1 : index
    %c0_11 = arith.constant 0 : index
    %c0_12 = arith.constant 0 : index
    %19 = vector.load %arg3[%c1, %c0_11, %c0_12] : memref<2x128x128xbf16, #tpu.memory_space<vmem>>, vector<1x128x128xbf16>
    %20 = vector.shape_cast %19 : vector<1x128x128xbf16> to vector<128x128xbf16>
    %cst_13 = arith.constant dense<0.000000e+00> : vector<16x128xf32>
    %21 = tpu.matmul %18, %20, %cst_13 {dimension_numbers = #tpu.dot_dimension_numbers<[1], [0], [0], [1], [0, 0, 1, 1], [], []>} : vector<16x128xbf16>, vector<128x128xbf16>, vector<16x128xf32> -> vector<16x128xf32>
    %22 = vector.extract_strided_slice %0 {offsets = [2, 0], sizes = [1, 128], strides = [1, 1]} : vector<3x128xf32> to vector<1x128xf32>
    %23 = vector.broadcast %22 : vector<1x128xf32> to vector<16x128xf32>
    %24 = arith.addf %21, %23 : vector<16x128xf32>
    %25 = vector.extract_strided_slice %24 {offsets = [0, 0], sizes = [16, 4], strides = [1, 1]} : vector<16x128xf32> to vector<16x4xf32>
    %c0_14 = arith.constant 0 : index
    %c0_15 = arith.constant 0 : index
    %26 = vector.load %arg5[%c0_14, %c0_15] : memref<16x4xf32, #tpu.memory_space<vmem>>, vector<16x4xf32>
    tpu.vector_store %arg5[%c0_14, %c0_15], %25 {strides = array<i32>} : memref<16x4xf32, #tpu.memory_space<vmem>>, vector<16x4xf32>,
    return
  }
  func.func @transform_0(%arg0: i32) -> (i32, i32) {
    %c0_i32 = arith.constant 0 : i32
    %c0_i32_0 = arith.constant 0 : i32
    return %arg0, %c0_i32 : i32, i32
  }
  func.func @transform_1(%arg0: i32) -> (i32, i32) {
    %c0_i32 = arith.constant 0 : i32
    %c0_i32_0 = arith.constant 0 : i32
    %c0_i32_1 = arith.constant 0 : i32
    return %c0_i32, %c0_i32_0 : i32, i32
  }
  func.func @transform_2(%arg0: i32) -> (i32, i32, i32) {
    %c0_i32 = arith.constant 0 : i32
    %c0_i32_0 = arith.constant 0 : i32
    %c0_i32_1 = arith.constant 0 : i32
    %c0_i32_2 = arith.constant 0 : i32
    return %c0_i32, %c0_i32_0, %c0_i32_1 : i32, i32, i32
  }
  func.func @transform_3(%arg0: i32) -> (i32, i32) {
    %c0_i32 = arith.constant 0 : i32
    %c0_i32_0 = arith.constant 0 : i32
    %c0_i32_1 = arith.constant 0 : i32
    return %c0_i32, %c0_i32_0 : i32, i32
  }
  func.func @transform_4(%arg0: i32) -> (i32, i32) {
    %c0_i32 = arith.constant 0 : i32
    %c0_i32_0 = arith.constant 0 : i32
    return %arg0, %c0_i32 : i32, i32
  }
}

</mosaic_0001>

<bundles_post_ra>
// kernel: dqn_forward.1
= control target key start
LH: loop header
LB: loop body
LE: loop exit
PB: predicated region body
PF: predicated region fallthrough
CT: control target
= control target key end

     0   :  { %9 = vsyncpa [#allocation3], 0  ;;  %s782_s15 = smov 0   ;;  %s874_s0 = inlined_call_operand.vmem [shape: bf16[48,8], index: 0, kind: input, shape index: {}]   ;;  %s875_s1 = inlined_call_operand.vmem [shape: bf16[8,128], index: 1, kind: input, shape index: {}]   ;;  %s876_s2 = inlined_call_operand.hbm [shape: bf16[2,128,128], index: 2, kind: input, shape index: {}]   ;;  %s877_s3 = inlined_call_operand.vmem [shape: f32[3,128], index: 3, kind: input, shape index: {}]   ;;  %s878_s4 = inlined_call_operand.vmem [shape: f32[48,4], index: 4, kind: output, shape index: {}]  }
   0x1 LB: > { %s575_s16 = sadd.s32 4294967295, %s750_s15   ;;  %p577_p0 = scmp.ge.s32.totalorder %s750_s15, 1  ;;  %s750_s15 = sphi %s782_s15, %s15_s15  }
   0x2   : > { %p135_p1 = scmp.lt.s32.totalorder %s750_s15, 4  ;;  %s752_s17 = smov [#allocation2]  }
   0x3   : > { %s150_s18 = sshll.u32 %s752_s17, 4  ;;  %p796_p3 = scmp.eq.s32.totalorder %s575_s16, 0  ;;  %s151_s18 = int_to_ptr.vmem [resolvable:$true] %s150_s18 }
   0x4   : > { %p790_p2 = pnand %p577_p0, %p135_p1  ;;  %s712_s24 = scalar_lea.hbm %s876_s2, 2048 }
   0x5   : > { %s883_s20 = scalar_select %p796_p3, 1, 0 }
   0x6   : > { %s882_s19 = scalar_select %p790_p2, 1, 0 }
   0x7   : > { %p676_p4 = pneg %p790_p2  ;;  %p713_p6 = scmp.ne.s32.totalorder %s876_s2, %s712_s24 }
   0x8   : > { %p719_p10 = scmp.lt.u32.totalorder %s712_s24, %s876_s2 }
   0x9   : > { %p804_p5 = pnand %p796_p3, %p676_p4 }
   0xb   : > { %p714_p7 = pneg %p804_p5 }
   0xd   : > { %p715_p8 = pnand %p714_p7, %p713_p6 }
   0xf   : > { %p716_p9 = pneg %p715_p8 }
  0x11   : > { %p721_p11 = pnand %p719_p10, %p716_p9 }
  0x13   : > { %724 = shalt.err (!%p721_p11)
}
  0x14   : > { %s725_s29 = scalar_lea.vmem %s151_s18, 2048  ;;  %p733_p1 = scmp.lt.s32.totalorder %s151_s18, %s151_s18 }
  0x15   : > { %p726_p12 = scmp.ne.s32.totalorder %s151_s18, %s725_s29  ;;  %p734_p4 = scmp.lt.s32.totalorder %s725_s29, %s725_s29 }
  0x17   : > { %p728_p13 = pnand %p726_p12, %p714_p7  ;;  %p735_p3 = por %p734_p4, %p733_p1 }
  0x19   : > { %p729_p0 = pneg %p728_p13 }
  0x1b   : > { %p736_p2 = pnand %p735_p3, %p729_p0 }
  0x1d   : > { %739 = shalt.err (!%p736_p2)
}
  0x1e   : > { %s753_s30 = smov 64   ;;  %s754_s5 = smov 4  }
  0x1f   : > { %679 = dma.hbm_to_vmem [thread:$0]  (!%p804_p5), %s876_s2, 2048, %s151_s18, [#allocation3], %s753_s30, %s753_s30, %s754_s5  }
  0x20   : > { %p885_p6 = scmp.ne.s32.totalorder %s882_s19, 0 }
  0x21   : > { %p886_p8 = scmp.ne.s32.totalorder (!%p885_p6), %s883_s20, 0 }
  0x22   : > { %178 = sbr.rel (%p885_p6) target bundleno = 706 (0x2c2), region = 36 }
  0x29   : > { %745 = dma.done.wait (%p886_p8), [#allocation3], 2048  }
  0x2a   : > { %747 = vsyncadd (%p886_p8), [#allocation3], 4294965248  ;;  %s582_s8 = sshll.u32 %s575_s16, 1  ;;  %v755_v0 = vmov 0.0   ;;  %vm756_vm0 = vmmov 0   ;;  %vm234_vm1 = vcmask 1043456   ;;  %v221_v18 = vlaneseq }
  0x2b   : > { %626 = vmatprep.subr.bf16.mxu0 %v755_v0  ;;  %628 = vmatprep.mubr.msk.bf16.mxu0 %vm756_vm0, %v755_v0  ;;  %p205_p2 = scmp.lt.s32.totalorder %s582_s8, 5  ;;  %v220_v1 = vld [vmem:[%s875_s1] sm:$0xf]  ;;  %vm230_vm2 = vcmask 64512   ;;  %v697_v5 = vld [vmem:[#allocation2 + $0x8] sm:$0xff]   ;;  %v698_v6 = vld [vmem:[#allocation2 + $0x10] sm:$0xff]  }
  0x2c   : > { %632 = vmatprep.subr.bf16.mxu1 %v755_v0  ;;  %648 = vmatprep.mubr.msk.bf16.mxu1 %vm756_vm0, %v755_v0  ;;  %v236_v2 = vsel %vm234_vm1, %v220_v1, 0  ;;  %v696_v4 = vld [vmem:[#allocation2] sm:$0xff]   ;;  %v699_v7 = vld [vmem:[#allocation2 + $0x18] sm:$0xff]   ;;  %v701_v9 = vld [vmem:[#allocation2 + $0x28] sm:$0xff]   ;;  %v222_v19 = vshrl.u32 %v221_v18, 7  ;;  %vm504_vm3 = vcmask 31744  }
  0x2d   : > { %s888_s8 = smov (!%p205_p2, %s582_s8), 5  ;;  %627 = vmatpush3.bf16.msra.mxu0 %v236_v2  ;;  %633 = vmatpush3.bf16.msra.mxu1 %v696_v4  ;;  %v700_v8 = vld [vmem:[#allocation2 + $0x20] sm:$0xff]   ;;  %v702_v10 = vld [vmem:[#allocation2 + $0x30] sm:$0xff]   ;;  %v703_v11 = vld [vmem:[#allocation2 + $0x38] sm:$0xff]  }
  0x2e   : > { %s583_s9 = sshll.u32 %s888_s8, 2  ;;  %652 = vmatprep.subr.bf16.mxu0 %v755_v0  ;;  %634 = vmatprep.subr.bf16.mxu1 %v755_v0  ;;  %v704_v12 = vld [vmem:[#allocation2 + $0x40] sm:$0xff]   ;;  %v705_v13 = vld [vmem:[#allocation2 + $0x48] sm:$0xff]   ;;  %v706_v14 = vld [vmem:[#allocation2 + $0x50] sm:$0xff]   ;;  %v223_v20 = vsub.s32 0, %v222_v19  ;;  %v300_v34 = vsub.s32 1, %v222_v19 }
  0x2f   : > { %s208_s12 = scalar_lea.vmem %s874_s0, %s583_s9  ;;  %v707_v15 = vld [vmem:[#allocation2 + $0x58] sm:$0xff]   ;;  %v708_v16 = vld [vmem:[#allocation2 + $0x60] sm:$0xff]   ;;  %v709_v17 = vld [vmem:[#allocation2 + $0x68] sm:$0xff]   ;;  %v413_v45 = vsub.s32 2, %v222_v19  ;;  %s585_s18 = sshll.u32 %s888_s8, 3 }
  0x30   : > { %v695_v3 = vld [vmem:[%s208_s12] sm:$0xff]   ;;  %v710_v32 = vld [vmem:[#allocation2 + $0x70] sm:$0xff]   ;;  %v711_v33 = vld [vmem:[#allocation2 + $0x78] sm:$0xff]   ;;  %s214_s21 = scalar_lea.vmem %s878_s4, %s585_s18 }
  0x31   : > { %629 = vmatmul.mubr.msk.bf16.vlgmr.msra.gmra.mrb[0].mxu0 %vm230_vm2, %v695_v3  ;;  %635 = vmatpush3.bf16.msra.mxu1 %v697_v5  ;;  %v217_v21 = vld [vmem:[%s877_s3] sm:$0x7] }
  0x32   : > { %668 = vmatprep.mubr.msk.bf16.mxu0 %vm756_vm0, %v755_v0  ;;  %636 = vmatprep.subr.bf16.mxu1 %v755_v0  ;;  %v224_v22 = vrot.slane %v217_v21, %v223_v20  ;;  %v301_v35 = vrot.slane %v217_v21, %v300_v34  ;;  %v414_v46 = vrot.slane %v217_v21, %v413_v45 }
  0x33   : > { %653 = vmatpush3.bf16.msra.mxu0 %v704_v12 }
  0x34   : > { %654 = vmatprep.subr.bf16.mxu0 %v755_v0 }
  0x35   : > { %637 = vmatpush3.bf16.msra.mxu1 %v698_v6 }
  0x36   : > { %638 = vmatprep.subr.bf16.mxu1 %v755_v0 }
  0x37   : > { %655 = vmatpush3.bf16.msra.mxu0 %v705_v13 }
  0x38   : > { %656 = vmatprep.subr.bf16.mxu0 %v755_v0 }
  0x39   : > { %639 = vmatpush3.bf16.msra.mxu1 %v699_v7 }
  0x3a   : > { %640 = vmatprep.subr.bf16.mxu1 %v755_v0 }
  0x3b   : > { %657 = vmatpush3.bf16.msra.mxu0 %v706_v14 }
  0x3c   : > { %658 = vmatprep.subr.bf16.mxu0 %v755_v0 }
  0x3d   : > { %641 = vmatpush3.bf16.msra.mxu1 %v700_v8 }
  0x3e   : > { %642 = vmatprep.subr.bf16.mxu1 %v755_v0 }
  0x3f   : > { %659 = vmatpush3.bf16.msra.mxu0 %v707_v15 }
  0x40   : > { %660 = vmatprep.subr.bf16.mxu0 %v755_v0 }
  0x41   : > { %643 = vmatpush3.bf16.msra.mxu1 %v701_v9 }
  0x42   : > { %644 = vmatprep.subr.bf16.mxu1 %v755_v0 }
  0x43   : > { %661 = vmatpush3.bf16.msra.mxu0 %v708_v16 }
  0x44   : > { %662 = vmatprep.subr.bf16.mxu0 %v755_v0 }
  0x45   : > { %645 = vmatpush3.bf16.msra.mxu1 %v702_v10 }
  0x46   : > { %646 = vmatprep.subr.bf16.mxu1 %v755_v0 }
  0x47   : > { %663 = vmatpush3.bf16.msra.mxu0 %v709_v17 }
  0x48   : > { %664 = vmatprep.subr.bf16.mxu0 %v755_v0 }
  0x49   : > { %647 = vmatpush3.bf16.msra.mxu1 %v703_v11 }
  0x4b   : > { %665 = vmatpush3.bf16.msra.mxu0 %v710_v32 }
  0x4c   : > { %666 = vmatprep.subr.bf16.mxu0 %v755_v0 }
  0x4f   : > { %667 = vmatpush3.bf16.msra.mxu0 %v711_v33 }
 0x104   : > { %v272_v23 = vpop.f32.mrb[0].mxu0 }
 0x105   : > { %v273_v24 = vadd.f32 %v272_v23, %v224_v22  ;;  %v630_v25 = vpop.f32.mrb[1].mxu0 }
 0x106   : > { %v275_v26 = vpop.f32.mrb[2].mxu0 }
 0x107   : > { %v276_v27 = vadd.f32 %v275_v26, %v224_v22  ;;  %v631_v28 = vpop.f32.mrb[3].mxu0  ;;  %v279_v29 = vmax.f32 %v273_v24, 0.0 }
 0x109   : > { %v280_v30 = vmax.f32 %v276_v27, 0.0 }
 0x10b   : > { %v281_v31 = vpack.c.bf16 %v280_v30, %v279_v29 }
 0x10d   : > { %649 = vmatmul.mubr.bf16.vlgmr.msra.gmra.mrb[0].mxu1 %v281_v31 }
 0x1e0   : > { %v384_v36 = vpop.f32.mrb[0].mxu1 }
 0x1e1   : > { %v385_v37 = vadd.f32 %v384_v36, %v301_v35  ;;  %v650_v38 = vpop.f32.mrb[1].mxu1 }
 0x1e2   : > { %v387_v39 = vpop.f32.mrb[2].mxu1 }
 0x1e3   : > { %v388_v40 = vadd.f32 %v387_v39, %v301_v35  ;;  %v651_v41 = vpop.f32.mrb[3].mxu1  ;;  %v391_v42 = vmax.f32 %v385_v37, 0.0 }
 0x1e5   : > { %v392_v43 = vmax.f32 %v388_v40, 0.0 }
 0x1e7   : > { %v393_v44 = vpack.c.bf16 %v392_v43, %v391_v42 }
 0x1e9   : > { %669 = vmatmul.mubr.bf16.vlgmr.msra.gmra.mrb[4].mxu0 %v393_v44 }
 0x2bc   : > { %v497_v47 = vpop.f32.mrb[4].mxu0 }
 0x2bd   : > { %v498_v48 = vadd.f32 %v497_v47, %v414_v46  ;;  %v670_v49 = vpop.f32.mrb[5].mxu0 }
 0x2be   : > { %v500_v50 = vpop.f32.mrb[6].mxu0 }
 0x2bf   : > { %505 = vst.msk [vmem:[%s214_s21] sm:$0xff] %vm504_vm3, %v498_v48  ;;  %v501_v51 = vadd.f32 %v500_v50, %v414_v46  ;;  %v671_v52 = vpop.f32.mrb[7].mxu0 }
 0x2c1   : > { %506 = vst.msk [vmem:[%s214_s21 + $0x8] sm:$0xff] %vm504_vm3, %v501_v51 }
 0x2c2 PF: > { %s15_s15 = sadd.s32 1, %s750_s15  }
 0x2c3   : > { %p12_p3 = scmp.ge.s32.totalorder %s15_s15, 5  }
 0x2c5   :  { %14 = sbr.rel (!%p12_p3) target bundleno = 1 (0x1), region = 72 }
 0x2cc   :  { %529 = vsyncpa [#allocation3], 1 }
 0x2cd   :  { %531 = vsyncpa [#allocation3 + $0x1], 1 }

</bundles_post_ra>
